<compile_context>
chip_gen: v7x
topology: tpu7x:2x2x1
jax: 0.10.0
libtpu: 0.0.40
codegen_flags: <defaults>
</compile_context>

<pallas_src>
import math

import jax
import jax.numpy as jnp
from jax.experimental import pallas as pl
from jax.experimental.pallas import tpu as pltpu

# Module constants (from lec12_basicRNN.py)
batch_size = 1
hidden_size = 5
input_size = 5
num_classes = 5
num_layers = 1
sequence_length = 1

assert hidden_size == num_classes, "out.view(-1, num_classes) requires hidden_size == num_classes"

# Padded (vreg-tile aligned) sizes used inside the kernel.
B_PAD = 8      # sublane tile (pads batch)
F_PAD = 128    # lane tile (pads both input_size and hidden_size)


def rnn_seq_kernel(x_ref, h0_ref, w_ref, b_ref, h_out_ref, h_scratch):
    """One grid step == one RNN timestep; hidden state carried in VMEM scratch.

    x_ref:     (B_PAD, F_PAD)       x_t, zero-padded (per-step block)
    h0_ref:    (B_PAD, F_PAD)       initial hidden, zero-padded (VMEM-resident)
    w_ref:     (2*F_PAD, F_PAD)     [W_ih^T ; W_hh^T], zero-padded (VMEM-resident)
    b_ref:     (1, F_PAD)           b_ih + b_hh, zero-padded (VMEM-resident)
    h_out_ref: (B_PAD, F_PAD)       h_t (lane-dense output block)
    h_scratch: (B_PAD, F_PAD) VMEM  hidden-state carry across timesteps
    """
    @pl.when(pl.program_id(0) == 0)
    def _():
        h_scratch[...] = h0_ref[...]

    # Single fused MXU pass: [x_t, h_{t-1}] @ [W_ih^T ; W_hh^T] + bias, then tanh (EUP).
    xh = jnp.concatenate([x_ref[...], h_scratch[...]], axis=-1)          # (B_PAD, 2*F_PAD)
    pre = jnp.dot(xh, w_ref[...], preferred_element_type=jnp.float32) + b_ref[...]
    h_new = jnp.tanh(pre)

    h_scratch[...] = h_new
    h_out_ref[...] = h_new


# Built once at module scope; entire sequence handled by a single pallas_call.
_rnn_seq = pl.pallas_call(
    rnn_seq_kernel,
    out_shape=jax.ShapeDtypeStruct((sequence_length, B_PAD, F_PAD), jnp.float32),
    grid=(sequence_length,),
    in_specs=[
        pl.BlockSpec((None, B_PAD, F_PAD), lambda t: (t, 0, 0)),   # x_t   (per-step block)
        pl.BlockSpec((B_PAD, F_PAD), lambda t: (0, 0)),            # h0    (resident)
        pl.BlockSpec((2 * F_PAD, F_PAD), lambda t: (0, 0)),        # W     (resident)
        pl.BlockSpec((1, F_PAD), lambda t: (0, 0)),                # bias  (resident)
    ],
    out_specs=pl.BlockSpec((None, B_PAD, F_PAD), lambda t: (t, 0, 0)),
    scratch_shapes=[pltpu.VMEM((B_PAD, F_PAD), jnp.float32)],
    compiler_params=pltpu.CompilerParams(
        dimension_semantics=("arbitrary",),   # sequential: h carried across timesteps
    ),
)


def init_params(key):
    """PyTorch nn.RNN init: U(-1/sqrt(hidden), 1/sqrt(hidden)).

    Also precomputes the fused + padded kernel operands ONCE (no per-forward
    transposes or bias adds)."""
    k1, k2, k3, k4 = jax.random.split(key, 4)
    bound = 1.0 / math.sqrt(hidden_size)
    w_ih = jax.random.uniform(k1, (hidden_size, input_size), jnp.float32, -bound, bound)
    w_hh = jax.random.uniform(k2, (hidden_size, hidden_size), jnp.float32, -bound, bound)
    b_ih = jax.random.uniform(k3, (hidden_size,), jnp.float32, -bound, bound)
    b_hh = jax.random.uniform(k4, (hidden_size,), jnp.float32, -bound, bound)

    w_fused = jnp.zeros((2 * F_PAD, F_PAD), jnp.float32)
    w_fused = w_fused.at[:input_size, :hidden_size].set(w_ih.T)
    w_fused = w_fused.at[F_PAD:F_PAD + hidden_size, :hidden_size].set(w_hh.T)
    b_fused = jnp.zeros((1, F_PAD), jnp.float32)
    b_fused = b_fused.at[0, :hidden_size].set(b_ih + b_hh)

    return {
        # raw parameters (kept for the pure-JAX reference check)
        "w_ih": w_ih, "w_hh": w_hh, "b_ih": b_ih, "b_hh": b_hh,
        # precomputed kernel operands
        "w_fused": w_fused, "b_fused": b_fused,
    }


@jax.jit
def model_forward(x, hidden, params):
    """Mirrors Model.forward: returns (hidden, out)."""
    x = x.reshape(batch_size, sequence_length, input_size)           # x.view(...)
    h0 = hidden[0]                                                   # layer 0: (batch, hidden)

    # Pad to vreg-tile-aligned blocks; valid data in the top-left corner.
    x_p = jnp.zeros((sequence_length, B_PAD, F_PAD), jnp.float32)
    x_p = x_p.at[:, :batch_size, :input_size].set(jnp.transpose(x, (1, 0, 2)))
    h0_p = jnp.zeros((B_PAD, F_PAD), jnp.float32)
    h0_p = h0_p.at[:batch_size, :hidden_size].set(h0)

    h_all = _rnn_seq(x_p, h0_p, params["w_fused"], params["b_fused"])  # (seq, 8, 128)

    out_seq = h_all[:, :batch_size, :hidden_size]                      # (seq, batch, hidden)
    out = jnp.transpose(out_seq, (1, 0, 2)).reshape(-1, num_classes)   # out.view(-1, num_classes)
    hidden_new = h_all[sequence_length - 1, :batch_size, :hidden_size][None]  # (layers, batch, hidden)
    return hidden_new, out


def init_hidden():
    return jnp.zeros((num_layers, batch_size, hidden_size), jnp.float32)


def _reference_forward(x, hidden, params):
    """Pure-JAX reference mirroring PyTorch nn.RNN (tanh), for correctness checking."""
    x = x.reshape(batch_size, sequence_length, input_size)
    h = hidden[0]
    outs = []
    for t in range(sequence_length):
        h = jnp.tanh(x[:, t, :] @ params["w_ih"].T + params["b_ih"]
                     + h @ params["w_hh"].T + params["b_hh"])
        outs.append(h)
    out = jnp.stack(outs, axis=1).reshape(-1, num_classes)
    return h[None], out


if __name__ == "__main__":
    key = jax.random.PRNGKey(0)
    k_params, k_x = jax.random.split(key)
    params = init_params(k_params)

    x = jax.random.normal(k_x, (batch_size, sequence_length, input_size), jnp.float32)
    hidden0 = init_hidden()

    hidden_new, out = model_forward(x, hidden0, params)
    jax.block_until_ready((hidden_new, out))

    assert hidden_new.shape == (num_layers, batch_size, hidden_size)
    assert out.shape == (batch_size * sequence_length, num_classes)

    h_ref, out_ref = _reference_forward(x, hidden0, params)
    assert jnp.allclose(hidden_new, h_ref, atol=1e-5, rtol=1e-5)
    assert jnp.allclose(out, out_ref, atol=1e-5, rtol=1e-5)

    print("KERNEL_OK")
</pallas_src>

<mosaic_0001>
module attributes {stable_mosaic.version = 11 : i64} {
  func.func @rnn_seq_kernel(%arg0: i32, %arg1: memref<1x8x128xf32, #tpu.memory_space<vmem>>, %arg2: memref<8x128xf32, #tpu.memory_space<vmem>>, %arg3: memref<256x128xf32, #tpu.memory_space<vmem>>, %arg4: memref<1x128xf32, #tpu.memory_space<vmem>>, %arg5: memref<1x8x128xf32, #tpu.memory_space<vmem>>, %arg6: memref<8x128xf32, #tpu.memory_space<vmem>>) attributes {dimension_semantics = [#tpu.dimension_semantics<arbitrary>], iteration_bounds = array<i64: 1>, scalar_prefetch = 0 : i64, scratch_operands = 1 : i64, tpu.core_type = #tpu.core_type<tc>, window_params = [{transform_indices = @transform_0, window_bounds = array<i64: 1, 8, 128>}, {pipeline_mode = #tpu.pipeline_mode<synchronous>, transform_indices = @transform_1, window_bounds = array<i64: 8, 128>}, {pipeline_mode = #tpu.pipeline_mode<synchronous>, transform_indices = @transform_2, window_bounds = array<i64: 256, 128>}, {pipeline_mode = #tpu.pipeline_mode<synchronous>, transform_indices = @transform_3, window_bounds = array<i64: 1, 128>}, {transform_indices = @transform_4, window_bounds = array<i64: 1, 8, 128>}]} {
    %c0_i32 = arith.constant 0 : i32
    %0 = arith.cmpi eq, %arg0, %c0_i32 : i32
    %1 = arith.extui %0 : i1 to i32
    %c0_i32_0 = arith.constant 0 : i32
    %2 = arith.cmpi ne, %1, %c0_i32_0 : i32
    scf.if %2 {
      %c0_14 = arith.constant 0 : index
      %c0_15 = arith.constant 0 : index
      %17 = vector.load %arg2[%c0_14, %c0_15] : memref<8x128xf32, #tpu.memory_space<vmem>>, vector<8x128xf32>
      %c0_16 = arith.constant 0 : index
      %c0_17 = arith.constant 0 : index
      %18 = vector.load %arg6[%c0_16, %c0_17] : memref<8x128xf32, #tpu.memory_space<vmem>>, vector<8x128xf32>
      tpu.vector_store %arg6[%c0_16, %c0_17], %17 {strides = array<i32>} : memref<8x128xf32, #tpu.memory_space<vmem>>, vector<8x128xf32>,
    } else {
    }
    %c0 = arith.constant 0 : index
    %c0_1 = arith.constant 0 : index
    %c0_2 = arith.constant 0 : index
    %3 = vector.load %arg1[%c0, %c0_1, %c0_2] : memref<1x8x128xf32, #tpu.memory_space<vmem>>, vector<1x8x128xf32>
    %4 = vector.shape_cast %3 : vector<1x8x128xf32> to vector<8x128xf32>
    %c0_3 = arith.constant 0 : index
    %c0_4 = arith.constant 0 : index
    %5 = vector.load %arg6[%c0_3, %c0_4] : memref<8x128xf32, #tpu.memory_space<vmem>>, vector<8x128xf32>
    %6 = tpu.concatenate %4, %5 in 1 : vector<8x128xf32>, vector<8x128xf32> -> vector<8x256xf32>
    %c0_5 = arith.constant 0 : index
    %c0_6 = arith.constant 0 : index
    %7 = vector.load %arg3[%c0_5, %c0_6] : memref<256x128xf32, #tpu.memory_space<vmem>>, vector<256x128xf32>
    %cst = arith.constant dense<0.000000e+00> : vector<8x128xf32>
    %8 = tpu.matmul %6, %7, %cst {dimension_numbers = #tpu.dot_dimension_numbers<[1], [0], [0], [1], [0, 0, 1, 1], [], []>} : vector<8x256xf32>, vector<256x128xf32>, vector<8x128xf32> -> vector<8x128xf32>
    %c0_7 = arith.constant 0 : index
    %c0_8 = arith.constant 0 : index
    %9 = vector.load %arg4[%c0_7, %c0_8] : memref<1x128xf32, #tpu.memory_space<vmem>>, vector<1x128xf32>
    %10 = vector.broadcast %9 : vector<1x128xf32> to vector<8x128xf32>
    %11 = arith.addf %8, %10 : vector<8x128xf32>
    %12 = math.tanh %11 : vector<8x128xf32>
    %c0_9 = arith.constant 0 : index
    %c0_10 = arith.constant 0 : index
    %13 = vector.load %arg6[%c0_9, %c0_10] : memref<8x128xf32, #tpu.memory_space<vmem>>, vector<8x128xf32>
    tpu.vector_store %arg6[%c0_9, %c0_10], %12 {strides = array<i32>} : memref<8x128xf32, #tpu.memory_space<vmem>>, vector<8x128xf32>,
    %c0_11 = arith.constant 0 : index
    %c0_12 = arith.constant 0 : index
    %c0_13 = arith.constant 0 : index
    %14 = vector.load %arg5[%c0_11, %c0_12, %c0_13] : memref<1x8x128xf32, #tpu.memory_space<vmem>>, vector<1x8x128xf32>
    %15 = vector.shape_cast %14 : vector<1x8x128xf32> to vector<8x128xf32>
    %16 = vector.shape_cast %12 : vector<8x128xf32> to vector<1x8x128xf32>
    tpu.vector_store %arg5[%c0_11, %c0_12, %c0_13], %16 {strides = array<i32>} : memref<1x8x128xf32, #tpu.memory_space<vmem>>, vector<1x8x128xf32>,
    return
  }
  func.func @transform_0(%arg0: i32) -> (i32, i32, i32) {
    %c0_i32 = arith.constant 0 : i32
    %c0_i32_0 = arith.constant 0 : i32
    %c0_i32_1 = arith.constant 0 : i32
    return %arg0, %c0_i32, %c0_i32_0 : i32, i32, i32
  }
  func.func @transform_1(%arg0: i32) -> (i32, i32) {
    %c0_i32 = arith.constant 0 : i32
    %c0_i32_0 = arith.constant 0 : i32
    %c0_i32_1 = arith.constant 0 : i32
    return %c0_i32, %c0_i32_0 : i32, i32
  }
  func.func @transform_2(%arg0: i32) -> (i32, i32) {
    %c0_i32 = arith.constant 0 : i32
    %c0_i32_0 = arith.constant 0 : i32
    %c0_i32_1 = arith.constant 0 : i32
    return %c0_i32, %c0_i32_0 : i32, i32
  }
  func.func @transform_3(%arg0: i32) -> (i32, i32) {
    %c0_i32 = arith.constant 0 : i32
    %c0_i32_0 = arith.constant 0 : i32
    %c0_i32_1 = arith.constant 0 : i32
    return %c0_i32, %c0_i32_0 : i32, i32
  }
  func.func @transform_4(%arg0: i32) -> (i32, i32, i32) {
    %c0_i32 = arith.constant 0 : i32
    %c0_i32_0 = arith.constant 0 : i32
    %c0_i32_1 = arith.constant 0 : i32
    return %arg0, %c0_i32, %c0_i32_0 : i32, i32, i32
  }
}

</mosaic_0001>

<bundles_post_ra>
// kernel: model_forward.1
= control target key start
LH: loop header
LB: loop body
LE: loop exit
PB: predicated region body
PF: predicated region fallthrough
CT: control target
= control target key end

     0   :  { %9 = vsyncpa [#allocation4], 0  ;;  %s253_s15 = smov [#allocation3]   ;;  %s305_s0 = inlined_call_operand.vmem [shape: f32[1,8,128], index: 0, kind: input, shape index: {}]   ;;  %s306_s1 = inlined_call_operand.vmem [shape: f32[8,128], index: 1, kind: input, shape index: {}]   ;;  %s307_s2 = inlined_call_operand.hbm [shape: f32[256,128], index: 2, kind: input, shape index: {}]   ;;  %s308_s3 = inlined_call_operand.vmem [shape: f32[1,128], index: 3, kind: input, shape index: {}]   ;;  %s309_s4 = inlined_call_operand.vmem [shape: f32[1,8,128], index: 4, kind: output, shape index: {}]  }
   0x1   :  { %s19_s16 = sshll.u32 %s253_s15, 4  ;;  %s229_s19 = scalar_lea.hbm %s307_s2, 4096  ;;  %s20_s16 = int_to_ptr.vmem [resolvable:$true] %s19_s16 }
   0x2   :  { %p230_p0 = scmp.ne.s32.totalorder %s307_s2, %s229_s19  ;;  %p233_p1 = scmp.lt.u32.totalorder %s229_s19, %s307_s2 }
   0x4   :  { %p235_p2 = pnand %p233_p1, %p230_p0 }
   0x6   :  { %238 = shalt.err (!%p235_p2)
}
   0x7   :  { %s239_s24 = scalar_lea.vmem %s20_s16, 4096  ;;  %p244_p4 = scmp.lt.s32.totalorder %s20_s16, %s20_s16 }
   0x8   :  { %p240_p3 = scmp.ne.s32.totalorder %s20_s16, %s239_s24  ;;  %p245_p5 = scmp.lt.s32.totalorder %s239_s24, %s239_s24 }
   0xa   :  { %p246_p6 = por %p245_p5, %p244_p4 }
   0xc   :  { %p247_p7 = pnand %p246_p6, %p240_p3 }
   0xe   :  { %250 = shalt.err (!%p247_p7)
}
   0xf   :  { %s254_s25 = smov 128   ;;  %s255_s26 = smov 8  }
  0x10   :  { %25 = dma.hbm_to_vmem [thread:$0]  %s307_s2, 4096, %s20_s16, [#allocation4], %s254_s25, %s254_s25, %s255_s26  }
  0x11   :  { %251 = dma.done.wait [#allocation4], 4096  }
  0x12   :  { %252 = vsyncadd [#allocation4], 4294963200  ;;  %v55_v0 = vld [vmem:[#allocation3 + $0x80] sm:$0xff]  ;;  %v56_v1 = vld [vmem:[#allocation3 + $0x88] sm:$0xff] }
  0x13   :  { %v39_v2 = vld [vmem:[#allocation3] sm:$0xff]  ;;  %v192_v3 = vpack.c.bf16 %v56_v1, %v55_v0  ;;  %v40_v4 = vld [vmem:[#allocation3 + $0x8] sm:$0xff]  ;;  %v57_v5 = vld [vmem:[#allocation3 + $0x90] sm:$0xff] }
  0x14   :  { %v58_v6 = vld [vmem:[#allocation3 + $0x98] sm:$0xff]  ;;  %v194_v7 = vpack.c.bf16 %v40_v4, %v39_v2  ;;  %v41_v9 = vld [vmem:[#allocation3 + $0x10] sm:$0xff]  ;;  %v59_v11 = vld [vmem:[#allocation3 + $0xa0] sm:$0xff] }
  0x15   :  { %v196_v8 = vpack.c.bf16 %v58_v6, %v57_v5  ;;  %v42_v10 = vld [vmem:[#allocation3 + $0x18] sm:$0xff]  ;;  %193 = vmatprep.subr.bf16.mxu0 %v192_v3  ;;  %v60_v12 = vld [vmem:[#allocation3 + $0xa8] sm:$0xff]  ;;  %v43_v15 = vld [vmem:[#allocation3 + $0x20] sm:$0xff] }
  0x16   :  { %195 = vmatpush3.bf16.msra.mxu0 %v194_v7  ;;  %v198_v13 = vpack.c.bf16 %v42_v10, %v41_v9  ;;  %v200_v14 = vpack.c.bf16 %v60_v12, %v59_v11  ;;  %v44_v16 = vld [vmem:[#allocation3 + $0x28] sm:$0xff]  ;;  %v61_v17 = vld [vmem:[#allocation3 + $0xb0] sm:$0xff]  ;;  %v62_v18 = vld [vmem:[#allocation3 + $0xb8] sm:$0xff] }
  0x17   :  { %197 = vmatprep.subr.bf16.mxu0 %v196_v8  ;;  %v202_v19 = vpack.c.bf16 %v44_v16, %v43_v15  ;;  %v204_v20 = vpack.c.bf16 %v62_v18, %v61_v17  ;;  %v45_v21 = vld [vmem:[#allocation3 + $0x30] sm:$0xff]  ;;  %v46_v22 = vld [vmem:[#allocation3 + $0x38] sm:$0xff]  ;;  %v63_v23 = vld [vmem:[#allocation3 + $0xc0] sm:$0xff] }
  0x18   :  { %v64_v24 = vld [vmem:[#allocation3 + $0xc8] sm:$0xff]  ;;  %v35_v25 = vld [vmem:[%s306_s1] sm:$0xff]  ;;  %v206_v26 = vpack.c.bf16 %v46_v22, %v45_v21  ;;  %v65_v30 = vld [vmem:[#allocation3 + $0xd0] sm:$0xff] }
  0x19   :  { %142 = vmatprep.mubr.f32.mxu0 %v35_v25  ;;  %v208_v27 = vpack.c.bf16 %v64_v24, %v63_v23  ;;  %v47_v28 = vld [vmem:[#allocation3 + $0x40] sm:$0xff]  ;;  %v48_v29 = vld [vmem:[#allocation3 + $0x48] sm:$0xff]  ;;  %v66_v31 = vld [vmem:[#allocation3 + $0xd8] sm:$0xff] }
  0x1a   :  { %199 = vmatpush3.bf16.msra.mxu0 %v198_v13  ;;  %v210_v32 = vpack.c.bf16 %v48_v29, %v47_v28  ;;  %v212_v33 = vpack.c.bf16 %v66_v31, %v65_v30  ;;  %v49_v34 = vld [vmem:[#allocation3 + $0x50] sm:$0xff]  ;;  %v50_v35 = vld [vmem:[#allocation3 + $0x58] sm:$0xff]  ;;  %v67_v36 = vld [vmem:[#allocation3 + $0xe0] sm:$0xff] }
  0x1b   :  { %201 = vmatprep.subr.bf16.mxu0 %v200_v14  ;;  %v68_v37 = vld [vmem:[#allocation3 + $0xe8] sm:$0xff]  ;;  %v214_v38 = vpack.c.bf16 %v50_v35, %v49_v34  ;;  %v51_v40 = vld [vmem:[#allocation3 + $0x60] sm:$0xff]  ;;  %v69_v42 = vld [vmem:[#allocation3 + $0xf0] sm:$0xff] }
  0x1c   :  { %v216_v39 = vpack.c.bf16 %v68_v37, %v67_v36  ;;  %v52_v41 = vld [vmem:[#allocation3 + $0x68] sm:$0xff]  ;;  %v70_v43 = vld [vmem:[#allocation3 + $0xf8] sm:$0xff]  ;;  %v53_v46 = vld [vmem:[#allocation3 + $0x70] sm:$0xff] }
  0x1d   :  { %v218_v44 = vpack.c.bf16 %v52_v41, %v51_v40  ;;  %v220_v45 = vpack.c.bf16 %v70_v43, %v69_v42  ;;  %v54_v47 = vld [vmem:[#allocation3 + $0x78] sm:$0xff]  ;;  %v37_v49 = vld [vmem:[%s305_s0] sm:$0xff] }
  0x1e   :  { %203 = vmatpush3.bf16.msra.mxu0 %v202_v19  ;;  %v222_v48 = vpack.c.bf16 %v54_v47, %v53_v46  ;;  %v156_v51 = vld [vmem:[%s308_s3] ss:$0 sm:$0xff] }
  0x1f   :  { %205 = vmatprep.subr.bf16.mxu0 %v204_v20 }
  0x22   :  { %207 = vmatpush3.bf16.msra.mxu0 %v206_v26 }
  0x23   :  { %209 = vmatprep.subr.bf16.mxu0 %v208_v27 }
  0x26   :  { %211 = vmatpush3.bf16.msra.mxu0 %v210_v32 }
  0x27   :  { %213 = vmatprep.subr.bf16.mxu0 %v212_v33 }
  0x2a   :  { %215 = vmatpush3.bf16.msra.mxu0 %v214_v38 }
  0x2b   :  { %217 = vmatprep.subr.bf16.mxu0 %v216_v39 }
  0x2e   :  { %219 = vmatpush3.bf16.msra.mxu0 %v218_v44 }
  0x2f   :  { %221 = vmatprep.subr.bf16.mxu0 %v220_v45 }
  0x32   :  { %223 = vmatpush3.bf16.msra.mxu0 %v222_v48 }
  0x35   :  { %143 = vmatmul.mubr.f32.vlgmr.msra.gmra.mrb[0].mxu0 %v37_v49 }
 0x108   :  { %v189_v50 = vpop.f32.mrb[0].mxu0 }
 0x109   :  { %v190_v52 = vpop.f32.mrb[1].mxu0 }
 0x10a   :  { %v191_v53 = vadd.f32 %v190_v52, %v189_v50 }
 0x10c   :  { %v145_v54 = vadd.f32 %v191_v53, %v156_v51 }
 0x10e   :  { %227 = vtanh.f32 %v145_v54 }
 0x118   :  { %v228_v55 = vpop.eup %227 }
 0x119   :  { %150 = vst [vmem:[%s309_s4] sm:$0xff] %v228_v55 }
 0x11a   :  { %155 = vsyncpa [#allocation4], 1 }

</bundles_post_ra>
